<compile_context>
chip_gen: v7x
topology: tpu7x:2x2x1
jax: 0.10.0
libtpu: 0.0.40
codegen_flags: <defaults>
</compile_context>

<pallas_src>
import functools

import jax
import jax.numpy as jnp
from jax.experimental import pallas as pl
from jax.experimental.pallas import tpu as pltpu


def _vmem_budget():
    """(f32 working-tile budget per block, vmem_limit_bytes) chosen from chip VMEM."""
    try:
        cap = int(pltpu.get_tpu_info().vmem_capacity_bytes)
    except Exception:
        cap = 128 * 1024 * 1024
    if cap <= 64 * 1024 * 1024:
        # v7x: 64 MiB physical per TC; leave room for double-buffered input + f32 temps.
        return 4 * 1024 * 1024, 40 * 1024 * 1024
    # v5e / v6e: 128 MiB physical VMEM.
    return 8 * 1024 * 1024, 64 * 1024 * 1024


def _pick_block_rows(n, c, sub, f32_tile_budget):
    """Rows per block: budget the (block_n, C) f32 working tile, round to sublane mult."""
    rows = f32_tile_budget // (4 * c)          # f32 working tile; bounds the input DMA too
    rows = max(sub, (rows // sub) * sub)
    if n <= rows:
        # Split small inputs into (at least) 2 blocks so dimension_semantics=('parallel',)
        # can shard the grid across both v7x TensorCores.
        half = (n + 1) // 2
        rows = max(sub, ((half + sub - 1) // sub) * sub)
    return rows


def _per_row_loss(logits, tgt, wt, *, label_smoothing):
    """Per-row loss. logits (TN,C) f32, tgt (TN,1) i32, wt (TN,1) f32 or None -> (TN,1) f32."""
    tn, c = logits.shape
    # Stable log-softmax pieces; log_probs itself is never materialized:
    #   -(smooth . log_probs) = lse - (smooth . shifted)   since sum(smooth) == 1.
    m = jnp.max(logits, axis=-1, keepdims=True)
    shifted = logits - m
    lse = jnp.log(jnp.sum(jnp.exp(shifted), axis=-1, keepdims=True))

    classes = jax.lax.broadcasted_iota(jnp.int32, (tn, c), 1)
    is_tgt = classes == tgt

    if label_smoothing > 0.0:
        # The PyTorch module ignores `weight` on the smoothing path.
        # Fused single reduction: coeff equals the smoothed label distribution.
        on = 1.0 - label_smoothing + label_smoothing / c
        off = label_smoothing / c
        coeff = jnp.where(is_tgt, on, off)
        smooth_dot = jnp.sum(coeff * shifted, axis=-1, keepdims=True)
        return lse - smooth_dot

    tgt_shifted = jnp.sum(jnp.where(is_tgt, shifted, 0.0), axis=-1, keepdims=True)
    ce = lse - tgt_shifted
    if wt is not None:
        ce = wt * ce
    return ce


def _wce_rowloss_kernel(*refs, label_smoothing, use_weight):
    if use_weight:
        logits_ref, tgt_ref, wt_ref, out_ref = refs
        wt = wt_ref[...]
    else:
        logits_ref, tgt_ref, out_ref = refs
        wt = None
    out_ref[...] = _per_row_loss(
        logits_ref[...].astype(jnp.float32), tgt_ref[...], wt,
        label_smoothing=label_smoothing)


def _wce_partial_kernel(*refs, label_smoothing, use_weight, block_n, n_valid, needs_mask):
    if use_weight:
        logits_ref, tgt_ref, wt_ref, out_ref = refs
        wt = wt_ref[...]
    else:
        logits_ref, tgt_ref, out_ref = refs
        wt = None
    loss = _per_row_loss(
        logits_ref[...].astype(jnp.float32), tgt_ref[...], wt,
        label_smoothing=label_smoothing)                     # (block_n, 1)
    if needs_mask:  # static: only when N % block_n != 0 (ragged final block, garbage rows)
        rows = pl.program_id(0) * block_n + jax.lax.broadcasted_iota(
            jnp.int32, (block_n, 1), 0)
        # select form (not multiply): garbage rows may hold Inf/NaN and must be dropped cleanly
        loss = jnp.where(rows < n_valid, loss, 0.0)
    # Per-block partial sum, replicated across one (8,128) tile so the output block stays
    # layout-aligned; the wrapper reads [:, 0, 0] and does the final sum/mean in JAX.
    out_ref[...] = jnp.zeros((1, 8, 128), jnp.float32) + jnp.sum(loss)


def weighted_cross_entropy_loss(logits, targets, weight=None, reduction="mean",
                                label_smoothing=0.0, block_rows=None):
    """Pallas implementation of WeightedCrossEntropyLoss.forward.

    logits: [N, C]; targets: int[N].  Returns scalar for 'mean'/'sum', f32[N] for 'none'.
    """
    n, c = logits.shape
    label_smoothing = float(label_smoothing)
    use_weight = (weight is not None) and (label_smoothing == 0.0)

    itemsize = jnp.dtype(logits.dtype).itemsize
    sub = max(8, 32 // itemsize)                 # sublane multiple: 8 f32, 16 bf16, 32 int8
    f32_budget, vmem_limit = _vmem_budget()

    if block_rows is None:
        block_n = _pick_block_rows(n, c, sub, f32_budget)
    else:
        block_n = max(sub, ((int(block_rows) + sub - 1) // sub) * sub)
    num_blocks = pl.cdiv(n, block_n)
    needs_mask = (n % block_n) != 0

    targets_i32 = targets.astype(jnp.int32)
    targets2d = targets_i32.reshape(n, 1)

    inputs = [logits, targets2d]
    in_specs = [
        pl.BlockSpec((block_n, c), lambda i: (i, 0)),
        pl.BlockSpec((block_n, 1), lambda i: (i, 0)),
    ]
    if use_weight:
        # N-element gather done once in XLA; streamed as a (block_n, 1) column.
        w_t = jnp.asarray(weight, jnp.float32)[targets_i32].reshape(n, 1)
        inputs.append(w_t)
        in_specs.append(pl.BlockSpec((block_n, 1), lambda i: (i, 0)))

    cparams = pltpu.CompilerParams(
        dimension_semantics=("parallel",),       # independent blocks -> 2 TCs on v7x
        vmem_limit_bytes=vmem_limit)

    if reduction in ("mean", "sum"):
        kernel = functools.partial(
            _wce_partial_kernel, label_smoothing=label_smoothing, use_weight=use_weight,
            block_n=block_n, n_valid=n, needs_mask=needs_mask)
        partials = pl.pallas_call(
            kernel,
            out_shape=jax.ShapeDtypeStruct((num_blocks, 8, 128), jnp.float32),
            grid_spec=pltpu.PrefetchScalarGridSpec(
                num_scalar_prefetch=0, grid=(num_blocks,),
                in_specs=in_specs,
                out_specs=pl.BlockSpec((1, 8, 128), lambda i: (i, 0, 0))),
            compiler_params=cparams,
        )(*inputs)
        total = jnp.sum(partials[:, 0, 0])
        return total / n if reduction == "mean" else total
    else:  # 'none'
        kernel = functools.partial(
            _wce_rowloss_kernel, label_smoothing=label_smoothing, use_weight=use_weight)
        out = pl.pallas_call(
            kernel,
            out_shape=jax.ShapeDtypeStruct((n, 1), jnp.float32),
            grid_spec=pltpu.PrefetchScalarGridSpec(
                num_scalar_prefetch=0, grid=(num_blocks,),
                in_specs=in_specs,
                out_specs=pl.BlockSpec((block_n, 1), lambda i: (i, 0))),
            compiler_params=cparams,
        )(*inputs)
        return out[:, 0]


def _reference_wce(logits, targets, weight=None, reduction="mean", label_smoothing=0.0):
    """Pure-JAX reference mirroring the PyTorch module exactly."""
    n, c = logits.shape
    log_probs = jax.nn.log_softmax(logits.astype(jnp.float32), axis=-1)
    if label_smoothing > 0:
        one_hot = jax.nn.one_hot(targets, c, dtype=jnp.float32)
        smooth = (1.0 - label_smoothing) * one_hot + label_smoothing / c
        loss = -jnp.sum(smooth * log_probs, axis=-1)
    else:
        nll = -jnp.take_along_axis(log_probs, targets[:, None].astype(jnp.int32), axis=-1)[:, 0]
        if weight is not None:
            nll = jnp.asarray(weight, jnp.float32)[targets] * nll
        loss = nll
    if reduction == "mean":
        return loss.mean()
    if reduction == "sum":
        return loss.sum()
    return loss


if __name__ == "__main__":
    key = jax.random.PRNGKey(0)
    k1, k2 = jax.random.split(key)
    N, C = 512, 128
    logits = jax.random.normal(k1, (N, C), dtype=jnp.float32)
    targets = jax.random.randint(k2, (N,), 0, C, dtype=jnp.int32)
    weight = jnp.linspace(0.5, 1.5, C, dtype=jnp.float32)

    cases = [
        dict(weight=None, reduction="mean", label_smoothing=0.0),      # module defaults
        dict(weight=weight, reduction="sum", label_smoothing=0.0),     # weighted CE
        dict(weight=weight, reduction="mean", label_smoothing=0.1),    # smoothing (weight ignored)
        dict(weight=weight, reduction="none", label_smoothing=0.0),    # per-sample losses
    ]
    for cfg in cases:
        out = jax.block_until_ready(weighted_cross_entropy_loss(logits, targets, **cfg))
        ref = _reference_wce(logits, targets, **cfg)
        assert jnp.allclose(out, ref, rtol=1e-5, atol=1e-5), (cfg, out, ref)

    # Ragged final block (no wrapper padding): N not a multiple of block_rows.
    N2 = 100
    logits2 = jax.random.normal(k1, (N2, C), dtype=jnp.float32)
    targets2 = jax.random.randint(k2, (N2,), 0, C, dtype=jnp.int32)
    out2 = jax.block_until_ready(
        weighted_cross_entropy_loss(logits2, targets2, weight=weight,
                                    reduction="mean", block_rows=64))
    ref2 = _reference_wce(logits2, targets2, weight=weight, reduction="mean")
    assert jnp.allclose(out2, ref2, rtol=1e-5, atol=1e-5), (out2, ref2)

    out2n = jax.block_until_ready(
        weighted_cross_entropy_loss(logits2, targets2, weight=weight,
                                    reduction="none", block_rows=64))
    ref2n = _reference_wce(logits2, targets2, weight=weight, reduction="none")
    assert jnp.allclose(out2n, ref2n, rtol=1e-5, atol=1e-5), (out2n, ref2n)

    # bf16 inputs exercise the 16-row sublane rounding path.
    logits_bf16 = logits.astype(jnp.bfloat16)
    out3 = jax.block_until_ready(
        weighted_cross_entropy_loss(logits_bf16, targets, weight=weight, reduction="mean"))
    ref3 = _reference_wce(logits_bf16, targets, weight=weight, reduction="mean")
    assert jnp.allclose(out3, ref3, rtol=1e-4, atol=1e-4), (out3, ref3)

    print("KERNEL_OK")
</pallas_src>

<mosaic_0001>
module attributes {stable_mosaic.version = 11 : i64} {
  func.func @_wce_partial_kernel(%arg0: i32, %arg1: memref<256x128xf32, #tpu.memory_space<vmem>>, %arg2: memref<256x1xi32, #tpu.memory_space<vmem>>, %arg3: memref<1x8x128xf32, #tpu.memory_space<vmem>>) attributes {dimension_semantics = [#tpu.dimension_semantics<parallel>], iteration_bounds = array<i64: 2>, scalar_prefetch = 0 : i64, scratch_operands = 0 : i64, tpu.core_type = #tpu.core_type<tc>, window_params = [{transform_indices = @transform_0, window_bounds = array<i64: 256, 128>}, {transform_indices = @transform_1, window_bounds = array<i64: 256, 1>}, {transform_indices = @transform_2, window_bounds = array<i64: 1, 8, 128>}]} {
    %c0 = arith.constant 0 : index
    %c0_0 = arith.constant 0 : index
    %0 = vector.load %arg1[%c0, %c0_0] : memref<256x128xf32, #tpu.memory_space<vmem>>, vector<256x128xf32>
    %c0_1 = arith.constant 0 : index
    %c0_2 = arith.constant 0 : index
    %1 = vector.load %arg2[%c0_1, %c0_2] : memref<256x1xi32, #tpu.memory_space<vmem>>, vector<256x1xi32>
    %cst = arith.constant dense<0xFF800000> : vector<256xf32>
    %2 = vector.multi_reduction <maximumf>, %0, %cst [1] : vector<256x128xf32> to vector<256xf32>
    %3 = vector.shape_cast %2 : vector<256xf32> to vector<256x1xf32>
    %4 = vector.broadcast %3 : vector<256x1xf32> to vector<256x128xf32>
    %5 = arith.subf %0, %4 : vector<256x128xf32>
    %6 = math.exp %5 : vector<256x128xf32>
    %cst_3 = arith.constant dense<0.000000e+00> : vector<256xf32>
    %7 = vector.multi_reduction <add>, %6, %cst_3 [1] : vector<256x128xf32> to vector<256xf32>
    %8 = vector.shape_cast %7 : vector<256xf32> to vector<256x1xf32>
    %9 = math.log %8 : vector<256x1xf32>
    %10 = tpu.iota {dimensions = array<i32: 1>} : vector<256x128xi32>
    %11 = vector.broadcast %1 : vector<256x1xi32> to vector<256x128xi32>
    %12 = arith.cmpi eq, %10, %11 : vector<256x128xi32>
    %cst_4 = arith.constant 0.000000e+00 : f32
    %13 = vector.broadcast %cst_4 : f32 to vector<256x128xf32>
    %14 = arith.select %12, %5, %13 : vector<256x128xi1>, vector<256x128xf32>
    %cst_5 = arith.constant dense<0.000000e+00> : vector<256xf32>
    %15 = vector.multi_reduction <add>, %14, %cst_5 [1] : vector<256x128xf32> to vector<256xf32>
    %16 = vector.shape_cast %15 : vector<256xf32> to vector<256x1xf32>
    %17 = arith.subf %9, %16 : vector<256x1xf32>
    %cst_6 = arith.constant 0.000000e+00 : f32
    %18 = vector.broadcast %cst_6 : f32 to vector<1x8x128xf32>
    %19 = vector.shape_cast %17 : vector<256x1xf32> to vector<1x256x1xf32>
    %cst_7 = arith.constant dense<0.000000e+00> : vector<1xf32>
    %20 = vector.multi_reduction <add>, %19, %cst_7 [1, 2] : vector<1x256x1xf32> to vector<1xf32>
    %21 = vector.shape_cast %20 : vector<1xf32> to vector<1x1x1xf32>
    %22 = vector.extract %21[0, 0, 0] : f32 from vector<1x1x1xf32>
    %23 = vector.broadcast %22 : f32 to vector<1x8x128xf32>
    %24 = arith.addf %18, %23 : vector<1x8x128xf32>
    %c0_8 = arith.constant 0 : index
    %c0_9 = arith.constant 0 : index
    %c0_10 = arith.constant 0 : index
    %25 = vector.load %arg3[%c0_8, %c0_9, %c0_10] : memref<1x8x128xf32, #tpu.memory_space<vmem>>, vector<1x8x128xf32>
    tpu.vector_store %arg3[%c0_8, %c0_9, %c0_10], %24 {strides = array<i32>} : memref<1x8x128xf32, #tpu.memory_space<vmem>>, vector<1x8x128xf32>,
    return
  }
  func.func @transform_0(%arg0: i32) -> (i32, i32) {
    %c0_i32 = arith.constant 0 : i32
    %c0_i32_0 = arith.constant 0 : i32
    return %arg0, %c0_i32 : i32, i32
  }
  func.func @transform_1(%arg0: i32) -> (i32, i32) {
    %c0_i32 = arith.constant 0 : i32
    %c0_i32_0 = arith.constant 0 : i32
    return %arg0, %c0_i32 : i32, i32
  }
  func.func @transform_2(%arg0: i32) -> (i32, i32, i32) {
    %c0_i32 = arith.constant 0 : i32
    %c0_i32_0 = arith.constant 0 : i32
    %c0_i32_1 = arith.constant 0 : i32
    return %arg0, %c0_i32, %c0_i32_0 : i32, i32, i32
  }
}

</mosaic_0001>

<bundles_post_ra>
// kernel: tpu_custom_call.1
= control target key start
LH: loop header
LB: loop body
LE: loop exit
PB: predicated region body
PF: predicated region fallthrough
CT: control target
= control target key end

     0   :  { %7 = vsyncpa [#allocation3], 0  ;;  %s2003_s0 = inlined_call_operand.hbm [shape: f32[512,128], index: 0, kind: input, shape index: {}]   ;;  %s2004_s1 = inlined_call_operand.hbm [shape: s32[512,1], index: 1, kind: input, shape index: {}]   ;;  %s2005_s2 = inlined_call_operand.hbm [shape: f32[2,8,128], index: 2, kind: output, shape index: {}]  }
   0x1   :  { %9 = vsyncpa [#allocation3 + $0x1], 0 }
   0x2   :  { %10 = vsyncpa [#allocation6], 0 }
   0x3   :  { %12 = vsyncpa [#allocation6 + $0x1], 0 }
   0x4   :  { %13 = vsyncpa [#allocation4], 0 }
   0x5   :  { %15 = vsyncpa [#allocation4 + $0x1], 0  ;;  %s1355_s9 = smov 0   ;;  %s1357_s10 = smov 0  }
   0x6   :  { %s1359_s11 = smov 0   ;;  %s1361_s12 = smov 0  }
   0x7 LB: > { %s1376_s13 = sadd.s32 4294967295, %s1332_s12   ;;  %s997_s14 = sadd.s32 4294967294, %s1332_s12   ;;  %s1332_s12 = sphi %s1361_s12, %s2028_s12   ;;  %s1328_s11 = sphi %s1359_s11, %s2027_s11   ;;  %s1324_s10 = sphi %s1357_s10, %s2026_s10   ;;  %s1320_s9 = sphi %s1355_s9, %s2025_s9  }
   0x8   : > { %s1380_s15 = sadd.s32 1, %s1332_s12   ;;  %s28_s16 = sadd.s32 1, %s1328_s11 }
   0x9   : > { %s25_s17 = ssub.s32 %s1332_s12, %s1380_s15  ;;  %p35_p0 = scmp.ne.s32.totalorder %s1328_s11, %s1324_s10 }
   0xa   : > { %p26_p1 = scmp.eq.s32.totalorder %s25_s17, 0  ;;  %p36_p2 = scmp.eq.s32.totalorder %s1332_s12, 0 }
   0xb   : > { %p41_p3 = scmp.ne.s32.totalorder %s1324_s10, %s1320_s9  ;;  %p42_p4 = scmp.eq.s32.totalorder %s1376_s13, 0 }
   0xc   : > { %s1392_s18 = scalar_select %p26_p1, %s1328_s11, %s28_s16  }
   0xd   : > { %p1394_p5 = por %p36_p2, %p35_p0  ;;  %p1398_p6 = por %p42_p4, %p41_p3 }
   0xe   : > { %p91_p7 = scmp.eq.s32.totalorder %s1376_s13, 1  ;;  %p97_p8 = scmp.eq.s32.totalorder %s997_s14, 1 }
   0xf   : > { %s2010_s20 = scalar_select %p1398_p6, 1, 0 }
  0x10   : > { %p1035_p10 = scmp.lt.s32.totalorder %s1332_s12, 2  ;;  %p1405_p11 = por %p91_p7, %p35_p0 }
  0x11   : > { %p1409_p12 = por %p97_p8, %p41_p3  ;;  %s1414_s23 = sand.u32 1, %s1328_s11  }
  0x12   : > { %s2011_s21 = scalar_select %p1405_p11, 1, 0 }
  0x13   : > { %s2012_s22 = scalar_select %p1409_p12, 1, 0 }
  0x14   : > { %s1014_s24 = sshll.u32 %s1332_s12, 12  ;;  %s1000_s25 = sshll.u32 %s1414_s23, 8 }
  0x15   : > { %s1423_s28 = scalar_lea.hbm %s2003_s0, %s1014_s24  ;;  %s121_s29 = scalar_lea.vmem [#allocation2], %s1000_s25 }
  0x16   : > { %s128_s30 = sshll.u32 %s121_s29, 4  ;;  %p1429_p13 = pnand %p1035_p10, %p1394_p5  ;;  %s1433_s30 = int_to_ptr.vmem [resolvable:$true] %s128_s30 }
  0x17   : > { %s118_s4 = scalar_lea.sflag [#allocation3], %s1414_s23  ;;  %s1202_s5 = scalar_lea.hbm %s1423_s28, 4096 }
  0x18   : > { %p1203_p0 = scmp.ne.s32.totalorder %s1423_s28, %s1202_s5  ;;  %p1204_p1 = pneg %p1429_p13 }
  0x19   : > { %s1207_s8 = scalar_lea.hbm %s2003_s0, 8192  ;;  %p1208_p4 = scmp.lt.u32.totalorder %s1423_s28, %s2003_s0 }
  0x1a   : > { %p1205_p2 = pnand %p1204_p1, %p1203_p0  ;;  %p1209_p5 = scmp.lt.u32.totalorder %s1207_s8, %s1202_s5 }
  0x1b   : > { %p1211_p8 = scmp.lt.u32.totalorder %s1202_s5, %s1423_s28 }
  0x1c   : > { %p1206_p3 = pneg %p1205_p2  ;;  %p1210_p7 = por %p1209_p5, %p1208_p4 }
  0x1e   : > { %p1212_p10 = por %p1211_p8, %p1210_p7 }
  0x20   : > { %p1213_p9 = pnand %p1212_p10, %p1206_p3 }
  0x22   : > { %1216 = shalt.err (!%p1213_p9)
}
  0x23   : > { %s1217_s17 = scalar_lea.vmem %s1433_s30, 4096  ;;  %s1334_s19 = smov [#allocation2]  }
  0x24   : > { %p1218_p0 = scmp.ne.s32.totalorder %s1433_s30, %s1217_s17  ;;  %s1222_s26 = sshll.u32 %s1334_s19, 4  ;;  %s1223_s26 = int_to_ptr.vmem [resolvable:$false] %s1222_s26 }
  0x25   : > { %s1224_s27 = scalar_lea.vmem %s1223_s26, 8192  ;;  %p1225_p11 = scmp.lt.s32.totalorder %s1433_s30, %s1223_s26 }
  0x26   : > { %p1220_p2 = pnand %p1218_p0, %p1204_p1  ;;  %p1226_p4 = scmp.lt.s32.totalorder %s1224_s27, %s1217_s17 }
  0x28   : > { %p1221_p12 = pneg %p1220_p2  ;;  %p1227_p5 = por %p1226_p4, %p1225_p11 }
  0x2a   : > { %p1228_p7 = pnand %p1227_p5, %p1221_p12 }
  0x2c   : > { %1231 = shalt.err (!%p1228_p7)
}
  0x2d   : > { %s1335_s29 = smov 128   ;;  %s1336_s5 = smov 8  }
  0x2e   : > { %1027 = dma.hbm_to_vmem [thread:$0]  (!%p1429_p13), %s1423_s28, 4096, %s1433_s30, %s118_s4, %s1335_s29, %s1335_s29, %s1336_s5  }
  0x2f   : > { %p1006_p9 = scmp.ge.s32.totalorder %s1332_s12, 1  ;;  %p157_p11 = scmp.lt.s32.totalorder %s1332_s12, 3 }
  0x30   : > { %s1477_s14 = scalar_lea.hbm %s2004_s1, %s1014_s24  ;;  %s142_s16 = scalar_lea.vmem [#allocation5], %s1000_s25 }
  0x31   : > { %p1468_p12 = pnand %p1006_p9, %p157_p11  ;;  %s149_s17 = sshll.u32 %s142_s16, 4  ;;  %s1481_s17 = int_to_ptr.vmem [resolvable:$true] %s149_s17 }
  0x32   : > { %s139_s28 = scalar_lea.sflag [#allocation6], %s1414_s23  ;;  %s1232_s30 = scalar_lea.hbm %s1477_s14, 4096 }
  0x33   : > { %p1233_p3 = scmp.ne.s32.totalorder %s1477_s14, %s1232_s30  ;;  %s1237_s24 = scalar_lea.hbm %s2004_s1, 8192 }
  0x34   : > { %p1238_p0 = scmp.lt.u32.totalorder %s1477_s14, %s2004_s1  ;;  %p1239_p2 = scmp.lt.u32.totalorder %s1237_s24, %s1232_s30 }
  0x35   : > { %p1235_p8 = pnand %p1233_p3, %p1204_p1  ;;  %p1241_p5 = scmp.lt.u32.totalorder %s1232_s30, %s1477_s14 }
  0x36   : > { %p1240_p4 = por %p1239_p2, %p1238_p0 }
  0x37   : > { %p1236_p10 = pneg %p1235_p8 }
  0x38   : > { %p1242_p7 = por %p1241_p5, %p1240_p4 }
  0x3a   : > { %p1243_p9 = pnand %p1242_p7, %p1236_p10 }
  0x3c   : > { %1246 = shalt.err (!%p1243_p9)
}
  0x3d   : > { %s1247_s25 = scalar_lea.vmem %s1481_s17, 4096  ;;  %s1337_s7 = smov [#allocation5]  }
  0x3e   : > { %p1248_p11 = scmp.ne.s32.totalorder %s1481_s17, %s1247_s25  ;;  %s1252_s8 = sshll.u32 %s1337_s7, 4  ;;  %s1253_s8 = int_to_ptr.vmem [resolvable:$false] %s1252_s8 }
  0x3f   : > { %s1254_s16 = scalar_lea.vmem %s1253_s8, 8192  ;;  %p1255_p6 = scmp.lt.s32.totalorder %s1481_s17, %s1253_s8 }
  0x40   : > { %p1250_p3 = pnand %p1248_p11, %p1204_p1  ;;  %p1256_p0 = scmp.lt.s32.totalorder %s1254_s16, %s1247_s25 }
  0x42   : > { %p1251_p8 = pneg %p1250_p3  ;;  %p1257_p2 = por %p1256_p0, %p1255_p6 }
  0x44   : > { %p1258_p4 = pnand %p1257_p2, %p1251_p8 }
  0x46   : > { %1261 = shalt.err (!%p1258_p4)
}
  0x47   : > { %1030 = dma.hbm_to_vmem [thread:$0]  (!%p1429_p13), %s1477_s14, 4096, %s1481_s17, %s139_s28, %s1335_s29, %s1335_s29, %s1336_s5  }
  0x48   : > { %161 = sbr.rel (%p1468_p12) target bundleno = 887 (0x377), region = 28 }
  0x4f   : > { %s1515_s30 = sand.u32 1, %s1324_s10   ;;  %p2015_p6 = scmp.ne.s32.totalorder %s2010_s20, 0 }
  0x50   : > { %s1007_s4 = sshll.u32 %s1515_s30, 8  ;;  %s164_s19 = scalar_lea.sflag [#allocation3], %s1515_s30 }
  0x51   : > { %s1519_s3 = scalar_lea.vmem [#allocation2], %s1007_s4 }
  0x52   : > { %1307 = dma.done.wait (%p2015_p6), %s164_s19, 4096  }
  0x53   : > { %1309 = vsyncadd (%p2015_p6), %s164_s19, 4294963200  ;;  %s173_s23 = scalar_lea.sflag [#allocation6], %s1515_s30  ;;  %s1526_s29 = scalar_lea.vmem [#allocation5], %s1007_s4 }
  0x54   : > { %1311 = dma.done.wait (%p2015_p6), %s173_s23, 4096  }
  0x55   : > { %1313 = vsyncadd (%p2015_p6), %s173_s23, 4294963200  ;;  %v1533_v0 = vld [vmem:[%s1519_s3] sm:$0xff]  ;;  %v1536_v1 = vld [vmem:[%s1519_s3 + $0x10] sm:$0xff]  ;;  %v1338_v22 = vmov 0   ;;  %s1009_s20 = sshll.u32 %s1515_s30, 3  ;;  %s1011_s14 = sshll.u32 %s1376_s13, 7 }
  0x56   : > { %268 = vmax.xlane.f32.xlu0 %v1533_v0  ;;  %272 = vmax.xlane.f32.xlu1 %v1536_v1  ;;  %v1541_v2 = vld [vmem:[%s1519_s3 + $0x8] sm:$0xff]  ;;  %v1544_v3 = vld [vmem:[%s1519_s3 + $0x18] sm:$0xff]  ;;  %v1552_v5 = vld [vmem:[%s1519_s3 + $0x20] sm:$0xff]  ;;  %s201_s5 = scalar_lea.vmem [#allocation7], %s1009_s20  ;;  %s1961_s26 = scalar_lea.hbm %s2005_s2, %s1011_s14 }
  0x57   : > { %v1549_v4 = vld [vmem:[%s1519_s3 + $0x28] sm:$0xff]  ;;  %v1557_v6 = vld [vmem:[%s1519_s3 + $0x38] sm:$0xff]  ;;  %v1560_v7 = vld [vmem:[%s1519_s3 + $0x30] sm:$0xff]  ;;  %1072 = vset.pattern.permute.xlu1 %v1338_v22  ;;  %1073 = vset.pattern.permute.xlu0 %v1338_v22  ;;  %s904_s6 = sshll.u32 %s201_s5, 4  ;;  %s891_s27 = scalar_lea.sflag [#allocation4], %s1515_s30  ;;  %s1956_s6 = int_to_ptr.vmem [resolvable:$true] %s904_s6 }
  0x58   : > { %v1565_v8 = vld [vmem:[%s1519_s3 + $0x48] sm:$0xff]  ;;  %v1568_v9 = vld [vmem:[%s1519_s3 + $0x40] sm:$0xff]  ;;  %v1573_v10 = vld [vmem:[%s1519_s3 + $0x58] sm:$0xff]  ;;  %s1262_s25 = scalar_lea.vmem %s1956_s6, 128  ;;  %p2022_p1 = scmp.ne.s32.totalorder %s2011_s21, 0 }
  0x59   : > { %v1576_v11 = vld [vmem:[%s1519_s3 + $0x50] sm:$0xff]  ;;  %v1581_v12 = vld [vmem:[%s1519_s3 + $0x68] sm:$0xff]  ;;  %v1584_v13 = vld [vmem:[%s1519_s3 + $0x60] sm:$0xff]  ;;  %p1263_p13 = scmp.ne.s32.totalorder %s1956_s6, %s1262_s25  ;;  %s1339_s13 = smov [#allocation7]  }
  0x5a   : > { %270 = vmax.xlane.f32.xlu0 %v1541_v2  ;;  %274 = vmax.xlane.f32.xlu1 %v1544_v3  ;;  %v1589_v14 = vld [vmem:[%s1519_s3 + $0x78] sm:$0xff]  ;;  %v1592_v15 = vld [vmem:[%s1519_s3 + $0x70] sm:$0xff]  ;;  %v1597_v16 = vld [vmem:[%s1519_s3 + $0x88] sm:$0xff]  ;;  %s1266_s7 = sshll.u32 %s1339_s13, 4  ;;  %s1267_s7 = int_to_ptr.vmem [resolvable:$false] %s1266_s7 }
  0x5b   : > { %v1600_v17 = vld [vmem:[%s1519_s3 + $0x80] sm:$0xff]  ;;  %v1605_v18 = vld [vmem:[%s1519_s3 + $0x90] sm:$0xff]  ;;  %v1608_v19 = vld [vmem:[%s1519_s3 + $0x98] sm:$0xff]  ;;  %p1264_p12 = pnand %p1263_p13, %p2022_p1  ;;  %s1268_s8 = scalar_lea.vmem %s1267_s7, 256 }
  0x5c   : > { %v1613_v20 = vld [vmem:[%s1519_s3 + $0xa0] sm:$0xff]  ;;  %v1616_v21 = vld [vmem:[%s1519_s3 + $0xa8] sm:$0xff]  ;;  %v1621_v23 = vld [vmem:[%s1519_s3 + $0xb0] sm:$0xff]  ;;  %p1269_p5 = scmp.lt.s32.totalorder %s1956_s6, %s1267_s7  ;;  %p1270_p7 = scmp.lt.s32.totalorder %s1268_s8, %s1262_s25 }
  0x5d   : > { %v1624_v24 = vld [vmem:[%s1519_s3 + $0xb8] sm:$0xff]  ;;  %v1629_v25 = vld [vmem:[%s1519_s3 + $0xc0] sm:$0xff]  ;;  %v1632_v26 = vld [vmem:[%s1519_s3 + $0xc8] sm:$0xff]  ;;  %p1265_p10 = pneg %p1264_p12 }
  0x5e   : > { %278 = vmax.xlane.f32.xlu1 %v1549_v4  ;;  %276 = vmax.xlane.f32.xlu0 %v1552_v5  ;;  %v1637_v27 = vld [vmem:[%s1519_s3 + $0xd0] sm:$0xff]  ;;  %v1640_v28 = vld [vmem:[%s1519_s3 + $0xd8] sm:$0xff]  ;;  %v1645_v29 = vld [vmem:[%s1519_s3 + $0xe0] sm:$0xff]  ;;  %p1271_p9 = por %p1270_p7, %p1269_p5 }
  0x5f   : > { %v1648_v30 = vld [vmem:[%s1519_s3 + $0xe8] sm:$0xff]  ;;  %v1653_v31 = vld [vmem:[%s1519_s3 + $0xf0] sm:$0xff]  ;;  %v1656_v32 = vld [vmem:[%s1519_s3 + $0xf8] sm:$0xff] }
  0x60   : > { %2016 = vst [vmem:[#allocation11_spill] sm:$0xff] %v1656_v32  ;;  %v237_v49 = vld [vmem:[%s1526_s29 + $0x8] sm:$0xff]  ;;  %v239_v50 = vld [vmem:[%s1526_s29 + $0x18] sm:$0xff]  ;;  %v236_v52 = vld [vmem:[%s1526_s29] sm:$0xff]  ;;  %p1272_p11 = pnand %p1271_p9, %p1265_p10 }
  0x61   : > { %v241_v51 = vld [vmem:[%s1526_s29 + $0x28] sm:$0xff]  ;;  %v243_v53 = vld [vmem:[%s1526_s29 + $0x38] sm:$0xff]  ;;  %v238_v54 = vld [vmem:[%s1526_s29 + $0x10] sm:$0xff] }
  0x62   : > { %282 = vmax.xlane.f32.xlu1 %v1557_v6  ;;  %280 = vmax.xlane.f32.xlu0 %v1560_v7  ;;  %v245_v55 = vld [vmem:[%s1526_s29 + $0x48] sm:$0xff]  ;;  %v240_v56 = vld [vmem:[%s1526_s29 + $0x20] sm:$0xff]  ;;  %v247_v57 = vld [vmem:[%s1526_s29 + $0x58] sm:$0xff] }
  0x63   : > { %v242_v58 = vld [vmem:[%s1526_s29 + $0x30] sm:$0xff]  ;;  %v249_v59 = vld [vmem:[%s1526_s29 + $0x68] sm:$0xff]  ;;  %v244_v60 = vld [vmem:[%s1526_s29 + $0x40] sm:$0xff] }
  0x64   : > { %v251_v61 = vld [vmem:[%s1526_s29 + $0x78] sm:$0xff]  ;;  %v246_v62 = vld [vmem:[%s1526_s29 + $0x50] sm:$0xff]  ;;  %v252_v63 = vld [vmem:[%s1526_s29 + $0x80] sm:$0xff] }
  0x65   : > { %v254_v22 = vld [vmem:[%s1526_s29 + $0x90] sm:$0xff] }
  0x66   : > { %286 = vmax.xlane.f32.xlu1 %v1565_v8  ;;  %284 = vmax.xlane.f32.xlu0 %v1568_v9 }
  0x6a   : > { %290 = vmax.xlane.f32.xlu1 %v1573_v10  ;;  %288 = vmax.xlane.f32.xlu0 %v1576_v11 }
  0x6e   : > { %294 = vmax.xlane.f32.xlu1 %v1581_v12  ;;  %292 = vmax.xlane.f32.xlu0 %v1584_v13 }
  0x72   : > { %298 = vmax.xlane.f32.xlu1 %v1589_v14  ;;  %296 = vmax.xlane.f32.xlu0 %v1592_v15 }
  0x76   : > { %302 = vmax.xlane.f32.xlu1 %v1597_v16  ;;  %300 = vmax.xlane.f32.xlu0 %v1600_v17 }
  0x7a   : > { %304 = vmax.xlane.f32.xlu1 %v1605_v18  ;;  %306 = vmax.xlane.f32.xlu0 %v1608_v19 }
  0x7e   : > { %308 = vmax.xlane.f32.xlu1 %v1613_v20  ;;  %310 = vmax.xlane.f32.xlu0 %v1616_v21 }
  0x82   : > { %312 = vmax.xlane.f32.xlu1 %v1621_v23  ;;  %314 = vmax.xlane.f32.xlu0 %v1624_v24 }
  0x86   : > { %316 = vmax.xlane.f32.xlu1 %v1629_v25  ;;  %318 = vmax.xlane.f32.xlu0 %v1632_v26 }
  0x8a   : > { %320 = vmax.xlane.f32.xlu1 %v1637_v27  ;;  %322 = vmax.xlane.f32.xlu0 %v1640_v28 }
  0x8e   : > { %324 = vmax.xlane.f32.xlu1 %v1645_v29  ;;  %326 = vmax.xlane.f32.xlu0 %v1648_v30 }
  0x92   : > { %328 = vmax.xlane.f32.xlu1 %v1653_v31  ;;  %330 = vmax.xlane.f32.xlu0 %v1656_v32 }
  0xe3   : > { %v269_v33 = vpop.xlane.xlu0 %268  ;;  %v273_v34 = vpop.xlane.xlu1 %272 }
  0xe4   : > { %v1661_v35 = vsub.f32 %v1533_v0, %v269_v33  ;;  %v1664_v36 = vsub.f32 %v1536_v1, %v273_v34  ;;  %v248_v0 = vld [vmem:[%s1526_s29 + $0x60] sm:$0xff]  ;;  %v253_v1 = vld [vmem:[%s1526_s29 + $0x88] sm:$0xff]  ;;  %v255_v33 = vld [vmem:[%s1526_s29 + $0x98] sm:$0xff] }
  0xe5   : > { %v256_v34 = vld [vmem:[%s1526_s29 + $0xa0] sm:$0xff] }
  0xe6   : > { %v364_v37 = vmul.f32 1.442695, %v1661_v35  ;;  %v368_v38 = vmul.f32 1.442695, %v1664_v36 }
  0xe7   : > { %v271_v39 = vpop.xlane.xlu0 %270  ;;  %v275_v40 = vpop.xlane.xlu1 %274 }
  0xe8   : > { %1074 = vpow2.f32 %v364_v37  ;;  %v1669_v41 = vsub.f32 %v1541_v2, %v271_v39  ;;  %v1672_v42 = vsub.f32 %v1544_v3, %v275_v40  ;;  %v250_v2 = vld [vmem:[%s1526_s29 + $0x70] sm:$0xff]  ;;  %v261_v37 = vld [vmem:[%s1526_s29 + $0xc8] sm:$0xff] }
  0xe9   : > { %1076 = vpow2.f32 %v368_v38  ;;  %v257_v40 = vld [vmem:[%s1526_s29 + $0xa8] sm:$0xff] }
  0xea   : > { %v366_v43 = vmul.f32 1.442695, %v1669_v41  ;;  %v370_v44 = vmul.f32 1.442695, %v1672_v42 }
  0xeb   : > { %v279_v3 = vpop.xlane.xlu1 %278  ;;  %v277_v39 = vpop.xlane.xlu0 %276 }
  0xec   : > { %1078 = vpow2.f32 %v366_v43  ;;  %v263_v43 = vld [vmem:[%s1526_s29 + $0xd8] sm:$0xff] }
  0xed   : > { %1080 = vpow2.f32 %v370_v44 }
  0xef   : > { %v283_v38 = vpop.xlane.xlu1 %282 }
  0xf2   : > { %v1075_v45 = vpop.eup %1074 }
  0xf3   : > { %428 = vadd.xlane.f32.xlu1 %v1075_v45  ;;  %v1077_v46 = vpop.eup %1076  ;;  %v1700_v44 = vpop.xlane.xlu1 %286 }
  0xf4   : > { %v281_v45 = vpop.xlane.xlu0 %280 }
  0xf6   : > { %v1079_v47 = vpop.eup %1078 }
  0xf7   : > { %432 = vadd.xlane.f32.xlu1 %v1077_v46  ;;  %430 = vadd.xlane.f32.xlu0 %v1079_v47  ;;  %v1081_v48 = vpop.eup %1080  ;;  %v258_v46 = vld [vmem:[%s1526_s29 + $0xb0] sm:$0xff]  ;;  %v264_v47 = vld [vmem:[%s1526_s29 + $0xe0] sm:$0xff] }
  0xfb   : > { %434 = vadd.xlane.f32.xlu0 %v1081_v48  ;;  %v259_v48 = vld [vmem:[%s1526_s29 + $0xb8] sm:$0xff] }
 0x108   : > { %562 = vperm.xlu1 %1072, %v237_v49   ;;  %v267_v49 = vld [vmem:[%s1526_s29 + $0xf8] sm:$0xff] }
 0x10c   : > { %568 = vperm.xlu1 %1072, %v239_v50   ;;  %v1706_v50 = vpop.xlane.xlu1 %290 }
 0x110   : > { %574 = vperm.xlu1 %1072, %v241_v51   ;;  %v285_v51 = vpop.xlane.xlu0 %284 }
 0x111   : > { %559 = vperm.xlu0 %1073, %v236_v52   ;;  %v260_v52 = vld [vmem:[%s1526_s29 + $0xc0] sm:$0xff] }
 0x114   : > { %580 = vperm.xlu1 %1072, %v243_v53   ;;  %v1709_v53 = vpop.xlane.xlu1 %294 }
 0x115   : > { %565 = vperm.xlu0 %1073, %v238_v54   ;;  %v1711_v54 = vpop.xlane.xlu0 %288 }
 0x118   : > { %586 = vperm.xlu1 %1072, %v245_v55   ;;  %v262_v55 = vld [vmem:[%s1526_s29 + $0xd0] sm:$0xff] }
 0x119   : > { %571 = vperm.xlu0 %1073, %v240_v56   ;;  %v265_v56 = vld [vmem:[%s1526_s29 + $0xe8] sm:$0xff] }
 0x11c   : > { %592 = vperm.xlu1 %1072, %v247_v57   ;;  %v1715_v57 = vpop.xlane.xlu1 %298 }
 0x11d   : > { %577 = vperm.xlu0 %1073, %v242_v58   ;;  %v1717_v58 = vpop.xlane.xlu0 %292 }
 0x120   : > { %598 = vperm.xlu1 %1072, %v249_v59   ;;  %v266_v59 = vld [vmem:[%s1526_s29 + $0xf0] sm:$0xff] }
 0x121   : > { %583 = vperm.xlu0 %1073, %v244_v60   ;;  %v1720_v60 = vpop.xlane.xlu1 %302 }
 0x124   : > { %604 = vperm.xlu1 %1072, %v251_v61   ;;  %v1722_v61 = vpop.xlane.xlu0 %296 }
 0x125   : > { %589 = vperm.xlu0 %1073, %v246_v62   ;;  %v1724_v62 = vpop.xlane.xlu1 %304 }
 0x128   : > { %607 = vperm.xlu1 %1072, %v252_v63   ;;  %v1726_v63 = vpop.xlane.xlu0 %300 }
 0x129   : > { %595 = vperm.xlu0 %1073, %v248_v0   ;;  %v1728_v0 = vpop.xlane.xlu1 %308 }
 0x12c   : > { %610 = vperm.xlu1 %1072, %v253_v1   ;;  %v1730_v1 = vpop.xlane.xlu0 %306 }
 0x12d   : > { %601 = vperm.xlu0 %1073, %v250_v2   ;;  %v1733_v2 = vsub.f32 %v1552_v5, %v277_v39  ;;  %v1749_v5 = vsub.f32 %v1557_v6, %v283_v38 }
 0x130   : > { %613 = vperm.xlu1 %1072, %v254_v22   ;;  %v1735_v22 = vpop.xlane.xlu1 %312 }
 0x131   : > { %616 = vperm.xlu0 %1073, %v255_v33   ;;  %v1737_v33 = vpop.xlane.xlu0 %310 }
 0x134   : > { %619 = vperm.xlu1 %1072, %v256_v34   ;;  %v337_v34 = vsub.f32 %v1549_v4, %v279_v3  ;;  %v378_v3 = vmul.f32 1.442695, %v1749_v5 }
 0x135   : > { %634 = vperm.xlu0 %1073, %v261_v37   ;;  %v372_v37 = vmul.f32 1.442695, %v1733_v2 }
 0x137   : > { %1082 = vpow2.f32 %v372_v37 }
 0x138   : > { %622 = vperm.xlu1 %1072, %v257_v40   ;;  %v1741_v40 = vpop.xlane.xlu1 %316 }
 0x139   : > { %640 = vperm.xlu0 %1073, %v263_v43   ;;  %v1743_v43 = vpop.xlane.xlu0 %314 }
 0x13c   : > { %625 = vperm.xlu1 %1072, %v258_v46   ;;  %v374_v46 = vmul.f32 1.442695, %v337_v34 }
 0x13d   : > { %643 = vperm.xlu0 %1073, %v264_v47   ;;  %v1746_v47 = vsub.f32 %v1560_v7, %v281_v45  ;;  %v1754_v4 = vpop.xlane.xlu0 %318 }
 0x13e   : > { %1084 = vpow2.f32 %v374_v46 }
 0x13f   : > { %v376_v39 = vmul.f32 1.442695, %v1746_v47 }
 0x140   : > { %628 = vperm.xlu1 %1072, %v259_v48   ;;  %v1752_v48 = vpop.xlane.xlu1 %320 }
 0x141   : > { %652 = vperm.xlu0 %1073, %v267_v49   ;;  %1086 = vpow2.f32 %v376_v39  ;;  %v1083_v49 = vpop.eup %1082 }
 0x142   : > { %1088 = vpow2.f32 %v378_v3  ;;  %v556_v3 = vlaneseq }
 0x144   : > { %631 = vperm.xlu1 %1072, %v260_v52   ;;  %v1757_v52 = vpop.xlane.xlu1 %324 }
 0x148   : > { %637 = vperm.xlu1 %1072, %v262_v55   ;;  %v1759_v55 = vpop.xlane.xlu0 %322  ;;  %v1085_v7 = vpop.eup %1084 }
 0x149   : > { %v1761_v6 = vpop.xlane.xlu1 %328 }
 0x14b   : > { %v1087_v45 = vpop.eup %1086 }
 0x14c   : > { %646 = vperm.xlu1 %1072, %v265_v56   ;;  %v1763_v38 = vpop.xlane.xlu0 %326  ;;  %v1766_v56 = vsub.f32 %v1568_v9, %v285_v51  ;;  %v1781_v9 = vsub.f32 %v1565_v8, %v1700_v44 }
 0x14e   : > { %v380_v37 = vmul.f32 1.442695, %v1766_v56 }
 0x150   : > { %649 = vperm.xlu1 %1072, %v266_v59   ;;  %v1089_v59 = vpop.eup %1088  ;;  %v1771_v39 = vpop.xlane.xlu0 %330  ;;  %1090 = vpow2.f32 %v380_v37 }
 0x174   : > { %436 = vadd.xlane.f32.xlu1 %v1083_v49 }
 0x178   : > { %438 = vadd.xlane.f32.xlu1 %v1085_v7  ;;  %v1775_v7 = vand.u32 127, %v556_v3  ;;  %v1790_v3 = vsub.f32 %v1576_v11, %v1711_v54  ;;  %v343_v11 = vsub.f32 %v1573_v10, %v1706_v50  ;;  %v345_v10 = vsub.f32 %v1581_v12, %v1709_v53 }
 0x179   : > { %v347_v53 = vsub.f32 %v1589_v14, %v1715_v57  ;;  %v349_v14 = vsub.f32 %v1597_v16, %v1720_v60  ;;  %v351_v60 = vsub.f32 %v1608_v19, %v1730_v1  ;;  %v353_v1 = vsub.f32 %v1616_v21, %v1737_v33 }
 0x17a   : > { %v355_v21 = vsub.f32 %v1624_v24, %v1743_v43  ;;  %v357_v43 = vsub.f32 %v1632_v26, %v1754_v4  ;;  %v359_v4 = vsub.f32 %v1640_v28, %v1759_v55  ;;  %v361_v55 = vsub.f32 %v1648_v30, %v1763_v38  ;;  %v2019_v38 = vld [vmem:[#allocation11_spill] sm:$0xff] }
 0x17c   : > { %440 = vadd.xlane.f32.xlu1 %v1087_v45 }
 0x180   : > { %v1769_v46 = vpop.xlane.xlu1 %428  ;;  %442 = vadd.xlane.f32.xlu1 %v1089_v59  ;;  %v382_v59 = vmul.f32 1.442695, %v1781_v9 }
 0x181   : > { %2017 = vst [vmem:[#allocation12_spill] sm:$0xff] %v1769_v46 }
 0x182   : > { %1092 = vpow2.f32 %v382_v59 }
 0x184   : > { %v1773_v49 = vpop.xlane.xlu1 %432  ;;  %v1777_v32 = vpop.xlane.xlu0 %430 }
 0x185   : > { %2018 = vst [vmem:[#allocation13_spill] sm:$0xff] %v1773_v49  ;;  %v1091_v49 = vpop.eup %1090 }
 0x188   : > { %v563_v51 = vpop.permute.xlu1 %562  ;;  %v1786_v46 = vpop.xlane.xlu0 %434 }
 0x189   : > { %vm655_vm0 = vcmp.eq.s32.totalorder %v1775_v7, %v563_v51 }
 0x18a   : > { %v687_v45 = vsel %vm655_vm0, %v1669_v41, 0.0  ;;  %v384_v41 = vmul.f32 1.442695, %v1790_v3 }
 0x18b   : > { %720 = vadd.xlane.f32.xlu1 %v687_v45 }
 0x18c   : > { %v569_v37 = vpop.permute.xlu1 %568  ;;  %1094 = vpow2.f32 %v384_v41 }
 0x18d   : > { %vm657_vm4 = vcmp.eq.s32.totalorder %v1775_v7, %v569_v37 }
 0x18f   : > { %444 = vadd.xlane.f32.xlu1 %v1091_v49 }
 0x190   : > { %v575_v8 = vpop.permute.xlu1 %574  ;;  %v560_v44 = vpop.permute.xlu0 %559 }
 0x191   : > { %vm654_vm1 = vcmp.eq.s32.totalorder %v1775_v7, %v560_v44  ;;  %vm659_vm2 = vcmp.eq.s32.totalorder %v1775_v7, %v575_v8  ;;  %v386_v8 = vmul.f32 1.442695, %v343_v11 }
 0x192   : > { %v686_v51 = vsel %vm654_vm1, %v1661_v35, 0.0  ;;  %v691_v49 = vsel %vm659_vm2, %v337_v34, 0.0  ;;  %v1093_v35 = vpop.eup %1092  ;;  %v689_v34 = vsel %vm657_vm4, %v1672_v42, 0.0  ;;  %v390_v42 = vmul.f32 1.442695, %v345_v10 }
 0x193   : > { %718 = vadd.xlane.f32.xlu0 %v686_v51  ;;  %v344_v51 = vsub.f32 %v1584_v13, %v1717_v58  ;;  %1096 = vpow2.f32 %v386_v8  ;;  %v346_v58 = vsub.f32 %v1592_v15, %v1722_v61  ;;  %v394_v15 = vmul.f32 1.442695, %v347_v53 }
 0x194   : > { %v566_v45 = vpop.permute.xlu0 %565  ;;  %v581_v54 = vpop.permute.xlu1 %580  ;;  %v348_v61 = vsub.f32 %v1600_v17, %v1726_v63  ;;  %v398_v17 = vmul.f32 1.442695, %v349_v14  ;;  %v350_v63 = vsub.f32 %v1605_v18, %v1724_v62  ;;  %v352_v18 = vsub.f32 %v1613_v20, %v1728_v0 }
 0x195   : > { %vm656_vm3 = vcmp.eq.s32.totalorder %v1775_v7, %v566_v45  ;;  %vm661_vm6 = vcmp.eq.s32.totalorder %v1775_v7, %v581_v54  ;;  %v388_v50 = vmul.f32 1.442695, %v344_v51  ;;  %v402_v62 = vmul.f32 1.442695, %v351_v60 }
 0x196   : > { %v688_v59 = vsel %vm656_vm3, %v1664_v36, 0.0  ;;  %v1095_v41 = vpop.eup %1094  ;;  %v693_v13 = vsel %vm661_vm6, %v1749_v5, 0.0  ;;  %v392_v5 = vmul.f32 1.442695, %v346_v58  ;;  %v396_v57 = vmul.f32 1.442695, %v348_v61 }
 0x197   : > { %728 = vadd.xlane.f32.xlu0 %v691_v49  ;;  %722 = vadd.xlane.f32.xlu1 %v688_v59  ;;  %1098 = vpow2.f32 %v388_v50  ;;  %v400_v16 = vmul.f32 1.442695, %v350_v63  ;;  %v404_v19 = vmul.f32 1.442695, %v352_v18  ;;  %v354_v20 = vsub.f32 %v1621_v23, %v1735_v22 }
 0x198   : > { %v572_v44 = vpop.permute.xlu0 %571  ;;  %v587_v36 = vpop.permute.xlu1 %586  ;;  %1100 = vpow2.f32 %v390_v42  ;;  %v406_v0 = vmul.f32 1.442695, %v353_v1  ;;  %v356_v23 = vsub.f32 %v1629_v25, %v1741_v40  ;;  %v410_v22 = vmul.f32 1.442695, %v355_v21 }
 0x199   : > { %vm658_vm7 = vcmp.eq.s32.totalorder %v1775_v7, %v572_v44  ;;  %vm663_vm9 = vcmp.eq.s32.totalorder %v1775_v7, %v587_v36  ;;  %1102 = vpow2.f32 %v392_v5  ;;  %v408_v5 = vmul.f32 1.442695, %v354_v20 }
 0x19a   : > { %v690_v59 = vsel %vm658_vm7, %v1733_v2, 0.0  ;;  %v695_v8 = vsel %vm663_vm9, %v1781_v9, 0.0  ;;  %1104 = vpow2.f32 %v394_v15  ;;  %v412_v24 = vmul.f32 1.442695, %v356_v23 }
 0x19b   : > { %446 = vadd.xlane.f32.xlu1 %v1093_v35  ;;  %1106 = vpow2.f32 %v396_v57  ;;  %v1854_v25 = vsub.f32 %v1637_v27, %v1752_v48  ;;  %v414_v40 = vmul.f32 1.442695, %v357_v43  ;;  %v360_v27 = vsub.f32 %v1645_v29, %v1757_v52 }
 0x19c   : > { %v578_v45 = vpop.permute.xlu0 %577  ;;  %1108 = vpow2.f32 %v398_v17  ;;  %v418_v48 = vmul.f32 1.442695, %v359_v4  ;;  %v362_v29 = vsub.f32 %v1653_v31, %v1761_v6  ;;  %v422_v52 = vmul.f32 1.442695, %v361_v55 }
 0x19d   : > { %vm660_vm5 = vcmp.eq.s32.totalorder %v1775_v7, %v578_v45  ;;  %v1097_v44 = vpop.eup %1096  ;;  %1110 = vpow2.f32 %v400_v16  ;;  %v416_v26 = vmul.f32 1.442695, %v1854_v25  ;;  %v420_v28 = vmul.f32 1.442695, %v360_v27 }
 0x19e   : > { %v692_v49 = vsel %vm660_vm5, %v1746_v47, 0.0  ;;  %v593_v47 = vpop.permute.xlu1 %592  ;;  %1112 = vpow2.f32 %v402_v62  ;;  %v424_v30 = vmul.f32 1.442695, %v362_v29 }
 0x19f   : > { %724 = vadd.xlane.f32.xlu1 %v689_v34  ;;  %730 = vadd.xlane.f32.xlu0 %v692_v49  ;;  %vm665_vm11 = vcmp.eq.s32.totalorder %v1775_v7, %v593_v47  ;;  %1114 = vpow2.f32 %v404_v19 }
 0x1a0   : > { %v584_v37 = vpop.permute.xlu0 %583  ;;  %v697_v34 = vsel %vm665_vm11, %v343_v11, 0.0  ;;  %1116 = vpow2.f32 %v406_v0 }
 0x1a1   : > { %vm662_vm8 = vcmp.eq.s32.totalorder %v1775_v7, %v584_v37  ;;  %v1099_v2 = vpop.eup %1098  ;;  %1118 = vpow2.f32 %v408_v5 }
 0x1a2   : > { %v694_v12 = vsel %vm662_vm8, %v1766_v56, 0.0  ;;  %v599_v35 = vpop.permute.xlu1 %598  ;;  %v1101_v36 = vpop.eup %1100  ;;  %1120 = vpow2.f32 %v410_v22 }
 0x1a3   : > { %448 = vadd.xlane.f32.xlu1 %v1095_v41  ;;  %732 = vadd.xlane.f32.xlu0 %v693_v13  ;;  %vm667_vm13 = vcmp.eq.s32.totalorder %v1775_v7, %v599_v35  ;;  %1122 = vpow2.f32 %v412_v24 }
 0x1a4   : > { %v590_v54 = vpop.permute.xlu0 %589  ;;  %v699_v41 = vsel %vm667_vm13, %v345_v10, 0.0  ;;  %1124 = vpow2.f32 %v414_v40 }
 0x1a5   : > { %vm664_vm10 = vcmp.eq.s32.totalorder %v1775_v7, %v590_v54  ;;  %1126 = vpow2.f32 %v416_v26 }
 0x1a6   : > { %v696_v56 = vsel %vm664_vm10, %v1790_v3, 0.0  ;;  %v605_v9 = vpop.permute.xlu1 %604  ;;  %v1103_v3 = vpop.eup %1102  ;;  %1128 = vpow2.f32 %v418_v48 }
 0x1a7   : > { %726 = vadd.xlane.f32.xlu1 %v690_v59  ;;  %734 = vadd.xlane.f32.xlu0 %v694_v12  ;;  %v1105_v37 = vpop.eup %1104  ;;  %vm669_vm15 = vcmp.eq.s32.totalorder %v1775_v7, %v605_v9  ;;  %1130 = vpow2.f32 %v420_v28 }
 0x1a8   : > { %v596_v45 = vpop.permute.xlu0 %595  ;;  %v1107_v13 = vpop.eup %1106  ;;  %v701_v59 = vsel %vm669_vm15, %v347_v53, 0.0  ;;  %1132 = vpow2.f32 %v422_v52 }
 0x1a9   : > { %vm666_vm12 = vcmp.eq.s32.totalorder %v1775_v7, %v596_v45  ;;  %v1109_v10 = vpop.eup %1108  ;;  %1134 = vpow2.f32 %v424_v30 }
 0x1aa   : > { %v608_v49 = vpop.permute.xlu1 %607  ;;  %v698_v50 = vsel %vm666_vm12, %v344_v51, 0.0 }
 0x1ab   : > { %450 = vadd.xlane.f32.xlu1 %v1097_v44  ;;  %736 = vadd.xlane.f32.xlu0 %v695_v8  ;;  %vm670_vm0 = vcmp.eq.s32.totalorder %v1775_v7, %v608_v49 }
 0x1ac   : > { %v602_v11 = vpop.permute.xlu0 %601  ;;  %v702_v12 = vsel %vm670_vm0, %v348_v61, 0.0  ;;  %vm814_vm0 = vcmask 7168  }
 0x1ad   : > { %vm668_vm14 = vcmp.eq.s32.totalorder %v1775_v7, %v602_v11 }
 0x1ae   : > { %v611_v51 = vpop.permute.xlu1 %610  ;;  %v700_v42 = vsel %vm668_vm14, %v346_v58, 0.0  ;;  %v1111_v58 = vpop.eup %1110 }
 0x1af   : > { %452 = vadd.xlane.f32.xlu1 %v1099_v2  ;;  %738 = vadd.xlane.f32.xlu0 %v696_v56  ;;  %vm671_vm1 = vcmp.eq.s32.totalorder %v1775_v7, %v611_v51  ;;  %v1113_v53 = vpop.eup %1112 }
 0x1b0   : > { %v703_v54 = vsel %vm671_vm1, %v349_v14, 0.0  ;;  %v617_v44 = vpop.permute.xlu0 %616  ;;  %v1115_v35 = vpop.eup %1114 }
 0x1b1   : > { %vm673_vm3 = vcmp.eq.s32.totalorder %v1775_v7, %v617_v44  ;;  %v1117_v61 = vpop.eup %1116 }
 0x1b2   : > { %v614_v47 = vpop.permute.xlu1 %613  ;;  %v705_v2 = vsel %vm673_vm3, %v351_v60, 0.0  ;;  %v1119_v14 = vpop.eup %1118 }
 0x1b3   : > { %454 = vadd.xlane.f32.xlu1 %v1101_v36  ;;  %740 = vadd.xlane.f32.xlu0 %v697_v34  ;;  %vm672_vm2 = vcmp.eq.s32.totalorder %v1775_v7, %v614_v47  ;;  %v1121_v9 = vpop.eup %1120 }
 0x1b4   : > { %v704_v15 = vsel %vm672_vm2, %v350_v63, 0.0  ;;  %v1123_v34 = vpop.eup %1122  ;;  %v635_v17 = vpop.permute.xlu0 %634 }
 0x1b5   : > { %v1125_v49 = vpop.eup %1124  ;;  %vm679_vm9 = vcmp.eq.s32.totalorder %v1775_v7, %v635_v17 }
 0x1b6   : > { %v620_v33 = vpop.permute.xlu1 %619  ;;  %v1127_v60 = vpop.eup %1126  ;;  %v711_v62 = vsel %vm679_vm9, %v357_v43, 0.0 }
 0x1b7   : > { %456 = vadd.xlane.f32.xlu1 %v1103_v3  ;;  %742 = vadd.xlane.f32.xlu0 %v698_v50  ;;  %vm674_vm4 = vcmp.eq.s32.totalorder %v1775_v7, %v620_v33 }
 0x1b8   : > { %v706_v57 = vsel %vm674_vm4, %v352_v18, 0.0  ;;  %v641_v16 = vpop.permute.xlu0 %640  ;;  %v1129_v18 = vpop.eup %1128 }
 0x1b9   : > { %vm681_vm10 = vcmp.eq.s32.totalorder %v1775_v7, %v641_v16 }
 0x1ba   : > { %v623_v8 = vpop.permute.xlu1 %622 }
 0x1bb   : > { %458 = vadd.xlane.f32.xlu1 %v1105_v37  ;;  %744 = vadd.xlane.f32.xlu0 %v699_v41  ;;  %vm675_vm5 = vcmp.eq.s32.totalorder %v1775_v7, %v623_v8  ;;  %v363_v41 = vsub.f32 %v2019_v38, %v1771_v39 }
 0x1bc   : > { %v707_v36 = vsel %vm675_vm5, %v353_v1, 0.0  ;;  %v644_v51 = vpop.permute.xlu0 %643 }
 0x1bd   : > { %v426_v31 = vmul.f32 1.442695, %v363_v41  ;;  %vm682_vm14 = vcmp.eq.s32.totalorder %v1775_v7, %v644_v51 }
 0x1be   : > { %v626_v56 = vpop.permute.xlu1 %625 }
 0x1bf   : > { %460 = vadd.xlane.f32.xlu1 %v1107_v13  ;;  %746 = vadd.xlane.f32.xlu0 %v700_v42  ;;  %vm676_vm6 = vcmp.eq.s32.totalorder %v1775_v7, %v626_v56  ;;  %v1131_v13 = vpop.eup %1130  ;;  %v713_v42 = vsel %vm681_vm10, %v359_v4, 0.0  ;;  %1136 = vpow2.f32 %v426_v31 }
 0x1c0   : > { %v708_v63 = vsel %vm676_vm6, %v354_v20, 0.0  ;;  %v653_v19 = vpop.permute.xlu0 %652  ;;  %v1133_v1 = vpop.eup %1132 }
 0x1c1   : > { %vm685_vm12 = vcmp.eq.s32.totalorder %v1775_v7, %v653_v19 }
 0x1c2   : > { %v629_v45 = vpop.permute.xlu1 %628  ;;  %v717_v47 = vsel %vm685_vm12, %v363_v41, 0.0 }
 0x1c3   : > { %462 = vadd.xlane.f32.xlu1 %v1109_v10  ;;  %748 = vadd.xlane.f32.xlu0 %v701_v59  ;;  %vm677_vm7 = vcmp.eq.s32.totalorder %v1775_v7, %v629_v45  ;;  %v1135_v10 = vpop.eup %1134 }
 0x1c4   : > { %v709_v50 = vsel %vm677_vm7, %v355_v21, 0.0 }
 0x1c6   : > { %v632_v3 = vpop.permute.xlu1 %631 }
 0x1c7   : > { %464 = vadd.xlane.f32.xlu1 %v1111_v58  ;;  %750 = vadd.xlane.f32.xlu0 %v702_v12  ;;  %vm678_vm8 = vcmp.eq.s32.totalorder %v1775_v7, %v632_v3  ;;  %v714_v58 = vsel %vm682_vm14, %v360_v27, 0.0 }
 0x1c8   : > { %v710_v11 = vsel %vm678_vm8, %v356_v23, 0.0  ;;  %v2021_v23 = vld [vmem:[#allocation13_spill] sm:$0xff] }
 0x1c9   : > { %v1137_v59 = vpop.eup %1136 }
 0x1ca   : > { %v638_v37 = vpop.permute.xlu1 %637 }
 0x1cb   : > { %466 = vadd.xlane.f32.xlu1 %v1113_v53  ;;  %752 = vadd.xlane.f32.xlu0 %v703_v54  ;;  %vm680_vm13 = vcmp.eq.s32.totalorder %v1775_v7, %v638_v37  ;;  %v2020_v53 = vld [vmem:[#allocation12_spill] sm:$0xff] }
 0x1cc   : > { %v712_v20 = vsel %vm680_vm13, %v1854_v25, 0.0  ;;  %1138 = vlog2.f32 %v2020_v53 }
 0x1cd   : > { %1140 = vlog2.f32 %v2021_v23 }
 0x1ce   : > { %v647_v6 = vpop.permute.xlu1 %646  ;;  %1142 = vlog2.f32 %v1777_v32 }
 0x1cf   : > { %468 = vadd.xlane.f32.xlu1 %v1115_v35  ;;  %754 = vadd.xlane.f32.xlu0 %v704_v15  ;;  %vm683_vm11 = vcmp.eq.s32.totalorder %v1775_v7, %v647_v6  ;;  %1144 = vlog2.f32 %v1786_v46 }
 0x1d0   : > { %v715_v39 = vsel %vm683_vm11, %v361_v55, 0.0 }
 0x1d2   : > { %v650_v0 = vpop.permute.xlu1 %649 }
 0x1d3   : > { %470 = vadd.xlane.f32.xlu1 %v1117_v61  ;;  %756 = vadd.xlane.f32.xlu0 %v705_v2  ;;  %vm684_vm15 = vcmp.eq.s32.totalorder %v1775_v7, %v650_v0 }
 0x1d4   : > { %v716_v5 = vsel %vm684_vm15, %v362_v29, 0.0 }
 0x1d6   : > { %v1139_v44 = vpop.eup %1138 }
 0x1d7   : > { %472 = vadd.xlane.f32.xlu1 %v1119_v14  ;;  %758 = vadd.xlane.f32.xlu0 %v706_v57  ;;  %v1141_v7 = vpop.eup %1140  ;;  %v493_v24 = vmul.f32 0.6931472, %v1139_v44 }
 0x1d8   : > { %v1143_v8 = vpop.eup %1142  ;;  %v497_v25 = vmul.f32 0.6931472, %v1141_v7 }
 0x1d9   : > { %v495_v61 = vmul.f32 0.6931472, %v1143_v8  ;;  %v1145_v14 = vpop.eup %1144 }
 0x1db   : > { %474 = vadd.xlane.f32.xlu1 %v1121_v9  ;;  %760 = vadd.xlane.f32.xlu0 %v707_v36  ;;  %v499_v9 = vmul.f32 0.6931472, %v1145_v14 }
 0x1df   : > { %476 = vadd.xlane.f32.xlu1 %v1123_v34  ;;  %762 = vadd.xlane.f32.xlu0 %v708_v63 }
 0x1e3   : > { %478 = vadd.xlane.f32.xlu1 %v1125_v49  ;;  %764 = vadd.xlane.f32.xlu0 %v709_v50 }
 0x1e7   : > { %480 = vadd.xlane.f32.xlu1 %v1127_v60  ;;  %766 = vadd.xlane.f32.xlu0 %v710_v11 }
 0x1eb   : > { %482 = vadd.xlane.f32.xlu1 %v1129_v18  ;;  %768 = vadd.xlane.f32.xlu0 %v711_v62 }
 0x1ef   : > { %484 = vadd.xlane.f32.xlu1 %v1131_v13  ;;  %772 = vadd.xlane.f32.xlu0 %v713_v42 }
 0x1f3   : > { %486 = vadd.xlane.f32.xlu1 %v1133_v1  ;;  %776 = vadd.xlane.f32.xlu0 %v715_v39 }
 0x1f7   : > { %488 = vadd.xlane.f32.xlu1 %v1135_v10  ;;  %780 = vadd.xlane.f32.xlu0 %v717_v47 }
 0x1fb   : > { %490 = vadd.xlane.f32.xlu1 %v1137_v59 }
 0x1ff   : > { %770 = vadd.xlane.f32.xlu1 %v712_v20 }
 0x201   : > { %v437_v12 = vpop.xlane.xlu1 %436 }
 0x202   : > { %1146 = vlog2.f32 %v437_v12 }
 0x203   : > { %774 = vadd.xlane.f32.xlu1 %v714_v58 }
 0x205   : > { %v439_v21 = vpop.xlane.xlu1 %438 }
 0x206   : > { %1148 = vlog2.f32 %v439_v21 }
 0x207   : > { %778 = vadd.xlane.f32.xlu1 %v716_v5 }
 0x209   : > { %v441_v33 = vpop.xlane.xlu1 %440 }
 0x20a   : > { %1150 = vlog2.f32 %v441_v33 }
 0x20c   : > { %v1147_v17 = vpop.eup %1146 }
 0x20d   : > { %v443_v54 = vpop.xlane.xlu1 %442  ;;  %v501_v52 = vmul.f32 0.6931472, %v1147_v17 }
 0x20e   : > { %1152 = vlog2.f32 %v443_v54 }
 0x210   : > { %v1149_v28 = vpop.eup %1148 }
 0x211   : > { %v503_v29 = vmul.f32 0.6931472, %v1149_v28 }
 0x214   : > { %v1151_v50 = vpop.eup %1150 }
 0x215   : > { %v505_v30 = vmul.f32 0.6931472, %v1151_v50 }
 0x218   : > { %v721_v22 = vpop.xlane.xlu1 %720  ;;  %v1153_v16 = vpop.eup %1152 }
 0x219   : > { %v783_v40 = vsub.f32 %v495_v61, %v721_v22  ;;  %v507_v18 = vmul.f32 0.6931472, %v1153_v16 }
 0x21b   : > { %v816_v26 = vsel %vm814_vm0, %v783_v40, 0.0 }
 0x21c   : > { %v1883_v35 = vpop.xlane.xlu1 %444 }
 0x21d   : > { %1154 = vlog2.f32 %v1883_v35 }
 0x220   : > { %v719_v15 = vpop.xlane.xlu0 %718 }
 0x221   : > { %v782_v2 = vsub.f32 %v493_v24, %v719_v15 }
 0x223   : > { %v815_v57 = vsel %vm814_vm0, %v782_v2, 0.0 }
 0x224   : > { %v723_v43 = vpop.xlane.xlu1 %722  ;;  %v729_v32 = vpop.xlane.xlu0 %728  ;;  %v817_v45 = vadd.f32 %v816_v26, %v815_v57 }
 0x225   : > { %v784_v56 = vsub.f32 %v497_v25, %v723_v43  ;;  %v787_v37 = vsub.f32 %v503_v29, %v729_v32 }
 0x227   : > { %v818_v4 = vsel %vm814_vm0, %v784_v56, 0.0  ;;  %v824_v13 = vsel %vm814_vm0, %v787_v37, 0.0  ;;  %v1155_v61 = vpop.eup %1154 }
 0x228   : > { %v447_v46 = vpop.xlane.xlu1 %446  ;;  %v819_v34 = vadd.f32 %v818_v4, %v817_v45  ;;  %v509_v35 = vmul.f32 0.6931472, %v1155_v61 }
 0x229   : > { %1156 = vlog2.f32 %v447_v46 }
 0x22c   : > { %v725_v36 = vpop.xlane.xlu1 %724  ;;  %v731_v27 = vpop.xlane.xlu0 %730 }
 0x22d   : > { %v785_v48 = vsub.f32 %v499_v9, %v725_v36  ;;  %v788_v41 = vsub.f32 %v505_v30, %v731_v27 }
 0x22f   : > { %v820_v63 = vsel %vm814_vm0, %v785_v48, 0.0  ;;  %v826_v1 = vsel %vm814_vm0, %v788_v41, 0.0 }
 0x230   : > { %v821_v55 = vadd.f32 %v820_v63, %v819_v34  ;;  %v449_v3 = vpop.xlane.xlu1 %448  ;;  %v733_v49 = vpop.xlane.xlu0 %732 }
 0x231   : > { %v789_v42 = vsub.f32 %v507_v18, %v733_v49  ;;  %1158 = vlog2.f32 %v449_v3 }
 0x233   : > { %v828_v59 = vsel %vm814_vm0, %v789_v42, 0.0  ;;  %v1157_v40 = vpop.eup %1156 }
 0x234   : > { %v727_v60 = vpop.xlane.xlu1 %726  ;;  %v735_v11 = vpop.xlane.xlu0 %734  ;;  %v511_v57 = vmul.f32 0.6931472, %v1157_v40 }
 0x235   : > { %v786_v38 = vsub.f32 %v501_v52, %v727_v60  ;;  %v790_v14 = vsub.f32 %v509_v35, %v735_v11 }
 0x237   : > { %v822_v62 = vsel %vm814_vm0, %v786_v38, 0.0  ;;  %v830_v9 = vsel %vm814_vm0, %v790_v14, 0.0 }
 0x238   : > { %v823_v51 = vadd.f32 %v822_v62, %v821_v55  ;;  %v451_v31 = vpop.xlane.xlu1 %450  ;;  %v737_v6 = vpop.xlane.xlu0 %736 }
 0x239   : > { %1160 = vlog2.f32 %v451_v31  ;;  %v791_v45 = vsub.f32 %v511_v57, %v737_v6 }
 0x23a   : > { %v825_v19 = vadd.f32 %v824_v13, %v823_v51 }
 0x23b   : > { %v1159_v56 = vpop.eup %1158  ;;  %v832_v55 = vsel %vm814_vm0, %v791_v45, 0.0 }
 0x23c   : > { %v827_v39 = vadd.f32 %v826_v1, %v825_v19  ;;  %v453_v10 = vpop.xlane.xlu1 %452  ;;  %v1892_v47 = vpop.xlane.xlu0 %738  ;;  %v513_v36 = vmul.f32 0.6931472, %v1159_v56 }
 0x23d   : > { %1162 = vlog2.f32 %v453_v10 }
 0x23e   : > { %v829_v20 = vadd.f32 %v828_v59, %v827_v39  ;;  %v792_v3 = vsub.f32 %v513_v36, %v1892_v47 }
 0x240   : > { %v455_v0 = vpop.xlane.xlu1 %454  ;;  %v1895_v58 = vpop.xlane.xlu0 %740  ;;  %v831_v34 = vadd.f32 %v830_v9, %v829_v20  ;;  %v834_v38 = vsel %vm814_vm0, %v792_v3, 0.0 }
 0x241   : > { %1164 = vlog2.f32 %v455_v0 }
 0x242   : > { %v833_v16 = vadd.f32 %v832_v55, %v831_v34 }
 0x243   : > { %v1161_v32 = vpop.eup %1160 }
 0x244   : > { %v457_v12 = vpop.xlane.xlu1 %456  ;;  %v1897_v5 = vpop.xlane.xlu0 %742  ;;  %v515_v27 = vmul.f32 0.6931472, %v1161_v32  ;;  %v835_v31 = vadd.f32 %v834_v38, %v833_v16 }
 0x245   : > { %1166 = vlog2.f32 %v457_v12 }
 0x246   : > { %v793_v49 = vsub.f32 %v515_v27, %v1895_v58 }
 0x247   : > { %v1163_v4 = vpop.eup %1162 }
 0x248   : > { %v459_v21 = vpop.xlane.xlu1 %458  ;;  %v1899_v33 = vpop.xlane.xlu0 %744  ;;  %v517_v63 = vmul.f32 0.6931472, %v1163_v4  ;;  %v836_v41 = vsel %vm814_vm0, %v793_v49, 0.0 }
 0x249   : > { %1168 = vlog2.f32 %v459_v21  ;;  %v837_v10 = vadd.f32 %v836_v41, %v835_v31 }
 0x24a   : > { %v794_v11 = vsub.f32 %v517_v63, %v1897_v5 }
 0x24b   : > { %v1165_v48 = vpop.eup %1164 }
 0x24c   : > { %v461_v53 = vpop.xlane.xlu1 %460  ;;  %v1901_v54 = vpop.xlane.xlu0 %746  ;;  %v519_v50 = vmul.f32 0.6931472, %v1165_v48  ;;  %v838_v13 = vsel %vm814_vm0, %v794_v11, 0.0 }
 0x24d   : > { %1170 = vlog2.f32 %v461_v53  ;;  %v839_v58 = vadd.f32 %v838_v13, %v837_v10 }
 0x24e   : > { %v795_v18 = vsub.f32 %v519_v50, %v1899_v33 }
 0x24f   : > { %v1167_v28 = vpop.eup %1166 }
 0x250   : > { %v463_v23 = vpop.xlane.xlu1 %462  ;;  %v1903_v22 = vpop.xlane.xlu0 %748  ;;  %v521_v37 = vmul.f32 0.6931472, %v1167_v28  ;;  %v840_v47 = vsel %vm814_vm0, %v795_v18, 0.0 }
 0x251   : > { %1172 = vlog2.f32 %v463_v23 }
 0x252   : > { %v796_v42 = vsub.f32 %v521_v37, %v1901_v54  ;;  %v841_v54 = vadd.f32 %v840_v47, %v839_v58 }
 0x253   : > { %v1169_v52 = vpop.eup %1168 }
 0x254   : > { %v465_v44 = vpop.xlane.xlu1 %464  ;;  %v1906_v7 = vpop.xlane.xlu0 %750  ;;  %v523_v62 = vmul.f32 0.6931472, %v1169_v52  ;;  %v842_v5 = vsel %vm814_vm0, %v796_v42, 0.0 }
 0x255   : > { %1174 = vlog2.f32 %v465_v44  ;;  %v843_v61 = vadd.f32 %v842_v5, %v841_v54 }
 0x256   : > { %v797_v59 = vsub.f32 %v523_v62, %v1903_v22 }
 0x257   : > { %v1171_v30 = vpop.eup %1170 }
 0x258   : > { %v467_v8 = vpop.xlane.xlu1 %466  ;;  %v1908_v15 = vpop.xlane.xlu0 %752  ;;  %v525_v19 = vmul.f32 0.6931472, %v1171_v30  ;;  %v844_v23 = vsel %vm814_vm0, %v797_v59, 0.0 }
 0x259   : > { %1176 = vlog2.f32 %v467_v8 }
 0x25a   : > { %v798_v21 = vsub.f32 %v525_v19, %v1906_v7  ;;  %v845_v7 = vadd.f32 %v844_v23, %v843_v61 }
 0x25b   : > { %v1173_v51 = vpop.eup %1172 }
 0x25c   : > { %v469_v24 = vpop.xlane.xlu1 %468  ;;  %v1910_v43 = vpop.xlane.xlu0 %754  ;;  %v527_v20 = vmul.f32 0.6931472, %v1173_v51  ;;  %v846_v35 = vsel %vm814_vm0, %v798_v21, 0.0 }
 0x25d   : > { %1178 = vlog2.f32 %v469_v24  ;;  %v847_v9 = vadd.f32 %v846_v35, %v845_v7 }
 0x25e   : > { %v799_v44 = vsub.f32 %v527_v20, %v1908_v15 }
 0x25f   : > { %v1175_v39 = vpop.eup %1174 }
 0x260   : > { %v471_v2 = vpop.xlane.xlu1 %470  ;;  %v1912_v25 = vpop.xlane.xlu0 %756  ;;  %v529_v33 = vmul.f32 0.6931472, %v1175_v39  ;;  %v848_v32 = vsel %vm814_vm0, %v799_v44, 0.0 }
 0x261   : > { %1180 = vlog2.f32 %v471_v2 }
 0x262   : > { %v800_v40 = vsub.f32 %v529_v33, %v1910_v43  ;;  %v849_v43 = vadd.f32 %v848_v32, %v847_v9 }
 0x263   : > { %v1177_v0 = vpop.eup %1176 }
 0x264   : > { %v473_v46 = vpop.xlane.xlu1 %472  ;;  %v1914_v26 = vpop.xlane.xlu0 %758  ;;  %v531_v8 = vmul.f32 0.6931472, %v1177_v0  ;;  %v850_v45 = vsel %vm814_vm0, %v800_v40, 0.0 }
 0x265   : > { %1182 = vlog2.f32 %v473_v46  ;;  %v851_v55 = vadd.f32 %v850_v45, %v849_v43 }
 0x266   : > { %v801_v46 = vsub.f32 %v531_v8, %v1912_v25 }
 0x267   : > { %v1179_v53 = vpop.eup %1178 }
 0x268   : > { %v475_v17 = vpop.xlane.xlu1 %474  ;;  %v1920_v29 = vpop.xlane.xlu0 %760  ;;  %v533_v56 = vmul.f32 0.6931472, %v1179_v53 }
 0x269   : > { %1184 = vlog2.f32 %v475_v17  ;;  %v852_v17 = vsel %vm814_vm0, %v801_v46, 0.0 }
 0x26a   : > { %v802_v36 = vsub.f32 %v533_v56, %v1914_v26  ;;  %v853_v16 = vadd.f32 %v852_v17, %v851_v55 }
 0x26b   : > { %v1181_v22 = vpop.eup %1180 }
 0x26c   : > { %v477_v60 = vpop.xlane.xlu1 %476  ;;  %v763_v1 = vpop.xlane.xlu0 %762  ;;  %v535_v57 = vmul.f32 0.6931472, %v1181_v22  ;;  %v854_v49 = vsel %vm814_vm0, %v802_v36, 0.0 }
 0x26d   : > { %1186 = vlog2.f32 %v477_v60  ;;  %v855_v30 = vadd.f32 %v854_v49, %v853_v16 }
 0x26e   : > { %v803_v63 = vsub.f32 %v535_v57, %v1920_v29 }
 0x26f   : > { %v1183_v14 = vpop.eup %1182 }
 0x270   : > { %v479_v6 = vpop.xlane.xlu1 %478  ;;  %v765_v24 = vpop.xlane.xlu0 %764  ;;  %v537_v27 = vmul.f32 0.6931472, %v1183_v14  ;;  %v856_v26 = vsel %vm814_vm0, %v803_v63, 0.0 }
 0x271   : > { %1188 = vlog2.f32 %v479_v6  ;;  %v857_v62 = vadd.f32 %v856_v26, %v855_v30 }
 0x272   : > { %v804_v50 = vsub.f32 %v537_v27, %v763_v1 }
 0x273   : > { %v1185_v4 = vpop.eup %1184 }
 0x274   : > { %v481_v12 = vpop.xlane.xlu1 %480  ;;  %v767_v48 = vpop.xlane.xlu0 %766  ;;  %v539_v28 = vmul.f32 0.6931472, %v1185_v4  ;;  %v858_v29 = vsel %vm814_vm0, %v804_v50, 0.0 }
 0x275   : > { %v859_v13 = vadd.f32 %v858_v29, %v857_v62 }
 0x276   : > { %v805_v60 = vsub.f32 %v539_v28, %v765_v24 }
 0x277   : > { %v1187_v34 = vpop.eup %1186 }
 0x278   : > { %v483_v2 = vpop.xlane.xlu1 %482  ;;  %v541_v52 = vmul.f32 0.6931472, %v1187_v34  ;;  %v769_v37 = vpop.xlane.xlu0 %768  ;;  %v860_v51 = vsel %vm814_vm0, %v805_v60, 0.0 }
 0x279   : > { %1190 = vlog2.f32 %v483_v2  ;;  %v861_v10 = vadd.f32 %v860_v51, %v859_v13 }
 0x27a   : > { %1192 = vlog2.f32 %v481_v12  ;;  %v806_v41 = vsub.f32 %v541_v52, %v767_v48 }
 0x27b   : > { %v1189_v25 = vpop.eup %1188 }
 0x27c   : > { %v485_v15 = vpop.xlane.xlu1 %484  ;;  %v543_v11 = vmul.f32 0.6931472, %v1189_v25  ;;  %v862_v19 = vsel %vm814_vm0, %v806_v41, 0.0  ;;  %v773_v39 = vpop.xlane.xlu0 %772 }
 0x27d   : > { %v863_v58 = vadd.f32 %v862_v19, %v861_v10 }
 0x27e   : > { %v807_v31 = vsub.f32 %v543_v11, %v769_v37 }
 0x280   : > { %v487_v3 = vpop.xlane.xlu1 %486  ;;  %v864_v59 = vsel %vm814_vm0, %v807_v31, 0.0  ;;  %v777_v54 = vpop.xlane.xlu0 %776 }
 0x281   : > { %1194 = vlog2.f32 %v487_v3  ;;  %v865_v53 = vadd.f32 %v864_v59, %v863_v58 }
 0x282   : > { %1196 = vlog2.f32 %v485_v15 }
 0x283   : > { %v1191_v18 = vpop.eup %1190 }
 0x284   : > { %v489_v38 = vpop.xlane.xlu1 %488  ;;  %v1193_v6 = vpop.eup %1192  ;;  %v547_v1 = vmul.f32 0.6931472, %v1191_v18 }
 0x285   : > { %1198 = vlog2.f32 %v489_v38  ;;  %v545_v20 = vmul.f32 0.6931472, %v1193_v6  ;;  %v781_v9 = vpop.xlane.xlu0 %780 }
 0x286   : > { %v809_v5 = vsub.f32 %v547_v1, %v773_v39 }
 0x288   : > { %v491_v42 = vpop.xlane.xlu1 %490  ;;  %v868_v61 = vsel %vm814_vm0, %v809_v5, 0.0 }
 0x289   : > { %1200 = vlog2.f32 %v491_v42 }
 0x28b   : > { %v1195_v47 = vpop.eup %1194 }
 0x28c   : > { %v1197_v0 = vpop.eup %1196  ;;  %v771_v12 = vpop.xlane.xlu1 %770  ;;  %v551_v21 = vmul.f32 0.6931472, %v1195_v47 }
 0x28d   : > { %v808_v33 = vsub.f32 %v545_v20, %v771_v12  ;;  %v549_v44 = vmul.f32 0.6931472, %v1197_v0 }
 0x28e   : > { %v811_v2 = vsub.f32 %v551_v21, %v777_v54 }
 0x28f   : > { %v866_v23 = vsel %vm814_vm0, %v808_v33, 0.0  ;;  %v1199_v8 = vpop.eup %1198 }
 0x290   : > { %v867_v24 = vadd.f32 %v866_v23, %v865_v53  ;;  %v775_v22 = vpop.xlane.xlu1 %774  ;;  %v553_v7 = vmul.f32 0.6931472, %v1199_v8  ;;  %v872_v4 = vsel %vm814_vm0, %v811_v2, 0.0 }
 0x291   : > { %v810_v35 = vsub.f32 %v549_v44, %v775_v22 }
 0x292   : > { %v869_v40 = vadd.f32 %v868_v61, %v867_v24 }
 0x293   : > { %v1201_v56 = vpop.eup %1200  ;;  %v870_v14 = vsel %vm814_vm0, %v810_v35, 0.0 }
 0x294   : > { %v555_v32 = vmul.f32 0.6931472, %v1201_v56  ;;  %v871_v46 = vadd.f32 %v870_v14, %v869_v40  ;;  %v779_v57 = vpop.xlane.xlu1 %778 }
 0x295   : > { %v812_v15 = vsub.f32 %v553_v7, %v779_v57 }
 0x296   : > { %v813_v45 = vsub.f32 %v555_v32, %v781_v9  ;;  %v873_v36 = vadd.f32 %v872_v4, %v871_v46 }
 0x297   : > { %v874_v27 = vsel %vm814_vm0, %v812_v15, 0.0 }
 0x298   : > { %v875_v48 = vadd.f32 %v874_v27, %v873_v36  ;;  %v876_v34 = vsel %vm814_vm0, %v813_v45, 0.0 }
 0x29a   : > { %v877_v43 = vadd.f32 %v876_v34, %v875_v48 }
 0x29c   : > { %878 = vadd.xlane.f32.xlu1 %v877_v43 }
 0x329   : > { %v879_v17 = vpop.xlane.xlu1 %878 }
 0x32a   : > { %v880_v63 = vrot.slane %v879_v17, 4 }
 0x32c   : > { %v881_v28 = vadd.f32 %v880_v63, %v879_v17 }
 0x32e   : > { %v882_v25 = vrot.slane %v881_v28, 2 }
 0x330   : > { %v883_v55 = vadd.f32 %v882_v25, %v881_v28 }
 0x332   : > { %v884_v3 = vrot.slane %v883_v55, 1 }
 0x334   : > { %v885_v49 = vadd.f32 %v884_v3, %v883_v55 }
 0x336   : > { %1016 = vpush %v885_v49 }
 0x367   : > { %s1017_s17 = spop %1016 }
 0x368   : > { %v887_v50 = vstv %s1017_s17 }
 0x369   : > { %889 = vst [vmem:[%s201_s5] sm:$0xff] %v887_v50 }
 0x36a   : > { %1275 = shalt.err (!%p1272_p11)
}
 0x36b   : > { %s1276_s16 = scalar_lea.hbm %s1961_s26, 128  ;;  %s1280_s19 = scalar_lea.hbm %s2005_s2, 256 }
 0x36c   : > { %p1277_p3 = scmp.ne.s32.totalorder %s1961_s26, %s1276_s16  ;;  %p1281_p2 = scmp.lt.u32.totalorder %s1961_s26, %s2005_s2 }
 0x36d   : > { %p1282_p4 = scmp.lt.u32.totalorder %s1280_s19, %s1276_s16  ;;  %p1284_p13 = scmp.lt.u32.totalorder %s1276_s16, %s1961_s26 }
 0x36e   : > { %p1278_p8 = pnand %p1277_p3, %p2022_p1 }
 0x36f   : > { %p1283_p6 = por %p1282_p4, %p1281_p2 }
 0x370   : > { %p1279_p0 = pneg %p1278_p8 }
 0x371   : > { %p1285_p12 = por %p1284_p13, %p1283_p6 }
 0x373   : > { %p1286_p10 = pnand %p1285_p12, %p1279_p0 }
 0x375   : > { %1289 = shalt.err (!%p1286_p10)
}
 0x376   : > { %1022 = dma.vmem_to_hbm [thread:$0]  (%p2022_p1), %s1956_s6, 128, %s1961_s26, %s891_s27  }
 0x377 PF: > { %s916_s29 = sand.u32 1, %s1320_s9   ;;  %p2023_p5 = scmp.ne.s32.totalorder %s2012_s22, 0 }
 0x378   : > { %p2024_p7 = scmp.ge.s32.totalorder %s1332_s12, 2  ;;  %s917_s20 = scalar_lea.sflag [#allocation4], %s916_s29 }
 0x37a   : > { %p1032_p9 = pnand %p2024_p7, %p2023_p5 }
 0x37c   : > { %1315 = dma.done.wait (!%p1032_p9), %s917_s20, 128  }
 0x37d   : > { %1317 = vsyncadd (!%p1032_p9), %s917_s20, 4294967168  ;;  %p18_p11 = scmp.ge.s32.totalorder %s1380_s15, 4   ;;  %s2025_s9 = smov %s1324_s10 }
 0x37e   : > { %s2026_s10 = smov %s1328_s11  ;;  %s2027_s11 = smov %s1392_s18 }
 0x37f   : > { %s2028_s12 = smov %s1380_s15  ;;  %20 = sbr.rel (!%p18_p11) target bundleno = 7 (0x7), region = 86 }
 0x386   :  { %922 = vsyncpa [#allocation3], 1 }
 0x387   :  { %924 = vsyncpa [#allocation3 + $0x1], 1 }
 0x388   :  { %925 = vsyncpa [#allocation6], 1 }
 0x389   :  { %927 = vsyncpa [#allocation6 + $0x1], 1 }
 0x38a   :  { %928 = vsyncpa [#allocation4], 1 }
 0x38b   :  { %930 = vsyncpa [#allocation4 + $0x1], 1 }

</bundles_post_ra>
